<compile_context>
chip_gen: v7x
topology: tpu7x:2x2x1
jax: 0.10.0
libtpu: 0.0.40
codegen_flags: <defaults>
</compile_context>

<pallas_src>
import functools

import jax
import jax.numpy as jnp
from jax import lax
from jax.experimental import pallas as pl
from jax.experimental.pallas import tpu as pltpu

_SQRT_HALF = 0.7071067811865476  # 1/sqrt(2)
_MIB = 1024 * 1024


def _gelu_exact(x):
    # PyTorch nn.GELU() default: 0.5 * x * (1 + erf(x / sqrt(2))).
    return 0.5 * x * (1.0 + lax.erf(x * _SQRT_HALF))


def _round_up(n, m):
    return ((n + m - 1) // m) * m


def _pad_to(a, shape):
    pads = [(0, t - s) for s, t in zip(a.shape, shape)]
    if all(p == (0, 0) for p in pads):
        return a
    return jnp.pad(a, pads)


def _detect_buffered():
    """Feature-detect BlockSpec(pipeline_mode=...).  If unavailable, resident
    weights are double-buffered; the VMEM budget below accounts for that
    explicitly so the kernel drops to the tiled path instead of silently
    over-subscribing VMEM."""
    try:
        pl.BlockSpec((8, 128), lambda i: (0, 0),
                     pipeline_mode=pl.Buffered(buffer_count=1))
        return True
    except Exception:
        return False


_HAS_BUFFERED = _detect_buffered()


def _vmem_capacity_bytes():
    try:
        cap = getattr(pltpu.get_tpu_info(), "vmem_capacity_bytes", None)
        if cap:
            return int(cap)
    except Exception:
        pass
    return 64 * _MIB  # conservative default (v7x per-TC); v5e/v6e have 128 MiB


def _default_tile_b():
    # v6e/v7x MXUs are 256-wide on M; v5e (and older) are 128-wide.
    try:
        kind = jax.devices()[0].device_kind.lower()
        if "v5" in kind or "v4" in kind:
            return 128
    except Exception:
        pass
    return 256


def _resident_spec(shape):
    """Weight/bias BlockSpec with constant index_map -> stays resident across
    all grid steps; single-buffered when the installed jax supports it."""
    index_map = lambda i: (0,) * len(shape)
    if _HAS_BUFFERED:
        return pl.BlockSpec(shape, index_map,
                            pipeline_mode=pl.Buffered(buffer_count=1))
    return pl.BlockSpec(shape, index_map)


# ----------------------------------------------------------------------------
# Fused 3-layer kernel (weights resident in VMEM).
# ----------------------------------------------------------------------------
def _fused_mlp_kernel(x_ref, w1_ref, b1_ref, w2_ref, b2_ref, w3_ref, b3_ref,
                      o_ref, *, n_subtiles):
    # Independent batch sub-tiles: the LLO scheduler can overlap one sub-tile's
    # GELU (VPU/EUP) with the other sub-tile's matmul (MXU).
    sub = x_ref.shape[0] // n_subtiles
    for s in range(n_subtiles):
        rows = pl.ds(s * sub, sub)
        x = x_ref[rows, :].astype(w1_ref.dtype)   # bf16 cast inside the kernel
        h = jnp.dot(x, w1_ref[...], preferred_element_type=jnp.float32)
        h = _gelu_exact(h + b1_ref[...])
        h = jnp.dot(h.astype(w2_ref.dtype), w2_ref[...],
                    preferred_element_type=jnp.float32)
        h = _gelu_exact(h + b2_ref[...])
        h = jnp.dot(h.astype(w3_ref.dtype), w3_ref[...],
                    preferred_element_type=jnp.float32)
        h = _gelu_exact(h + b3_ref[...])
        o_ref[rows, :] = h.astype(o_ref.dtype)


# ----------------------------------------------------------------------------
# Tiled per-layer fallback (for weights that do not fit per-TC VMEM).
# ----------------------------------------------------------------------------
def _linear_gelu_kernel(x_ref, w_ref, b_ref, o_ref, acc_ref):
    @pl.when(pl.program_id(2) == 0)
    def _():
        acc_ref[...] = jnp.zeros_like(acc_ref)

    acc_ref[...] += jnp.dot(x_ref[...].astype(w_ref.dtype), w_ref[...],
                            preferred_element_type=jnp.float32)

    @pl.when(pl.program_id(2) == pl.num_programs(2) - 1)
    def _():
        o_ref[...] = _gelu_exact(acc_ref[...] + b_ref[...]).astype(o_ref.dtype)


def _pick_div_tile(dim_p, cap):
    """Largest multiple of 128 that divides dim_p and is <= cap (dim_p is a
    multiple of 128, so this terminates at 128)."""
    t = max(128, min(cap, dim_p) // 128 * 128)
    while dim_p % t:
        t -= 128
    return t


def _linear_gelu_tiled(x, w, b, *, out_dtype, tm, vmem_cap,
                       tn_cap=512, tk_cap=512):
    M, K = x.shape
    N = w.shape[1]
    tn = _pick_div_tile(N, tn_cap)
    tk = _pick_div_tile(K, tk_cap)
    grid = (M // tm, N // tn, K // tk)

    obytes = jnp.dtype(out_dtype).itemsize
    budget = (2 * (tm * tk * x.dtype.itemsize + tk * tn * 2 + tn * 4
                   + tm * tn * obytes)
              + tm * tn * 4 + 8 * _MIB)
    vmem_limit = int(min(max(budget, 32 * _MIB),
                         max(vmem_cap - 4 * _MIB, 32 * _MIB)))
    cost = pl.CostEstimate(
        flops=2 * M * N * K,
        transcendentals=M * N,
        bytes_accessed=int(M * K * x.dtype.itemsize + K * N * 2 + N * 4
                           + M * N * obytes))

    return pl.pallas_call(
        _linear_gelu_kernel,
        out_shape=jax.ShapeDtypeStruct((M, N), out_dtype),
        grid_spec=pltpu.PrefetchScalarGridSpec(
            num_scalar_prefetch=0,
            grid=grid,
            in_specs=[pl.BlockSpec((tm, tk), lambda i, j, k: (i, k)),
                      pl.BlockSpec((tk, tn), lambda i, j, k: (k, j)),
                      pl.BlockSpec((1, tn), lambda i, j, k: (0, j))],
            out_specs=pl.BlockSpec((tm, tn), lambda i, j, k: (i, j)),
            scratch_shapes=[pltpu.VMEM((tm, tn), jnp.float32)]),
        compiler_params=pltpu.CompilerParams(
            dimension_semantics=("parallel", "parallel", "arbitrary"),
            vmem_limit_bytes=vmem_limit),
        cost_estimate=cost,
    )(x, w, b)


# ----------------------------------------------------------------------------
# Parameter preparation (one-time) and forward.
# ----------------------------------------------------------------------------
def prepare_params(params, compute_dtype=jnp.bfloat16):
    """Pad every feature dim to a multiple of 128 and cast weights to the MXU
    compute dtype ONCE, outside the per-call path.  Biases stay f32."""
    w1, b1 = params["w1"], params["b1"]
    w2, b2 = params["w2"], params["b2"]
    w3, b3 = params["w3"], params["b3"]
    d_in, d_mlp = w1.shape
    d_out = w3.shape[1]
    d_in_p, d_mlp_p, d_out_p = (_round_up(d, 128) for d in (d_in, d_mlp, d_out))
    return {
        "w1": _pad_to(w1, (d_in_p, d_mlp_p)).astype(compute_dtype),
        "b1": _pad_to(b1.reshape(1, -1), (1, d_mlp_p)).astype(jnp.float32),
        "w2": _pad_to(w2, (d_mlp_p, d_mlp_p)).astype(compute_dtype),
        "b2": _pad_to(b2.reshape(1, -1), (1, d_mlp_p)).astype(jnp.float32),
        "w3": _pad_to(w3, (d_mlp_p, d_out_p)).astype(compute_dtype),
        "b3": _pad_to(b3.reshape(1, -1), (1, d_out_p)).astype(jnp.float32),
    }


@functools.partial(jax.jit,
                   static_argnames=("d_out", "tile_b", "out_dtype",
                                    "force_tiled"))
def image_encoder_forward(x, prep, *, d_out, tile_b=None,
                          out_dtype=jnp.float32, force_tiled=False):
    """x: [B, d_in] f32.  prep: output of prepare_params().  Returns [B, d_out]."""
    w1, b1 = prep["w1"], prep["b1"]
    w2, b2 = prep["w2"], prep["b2"]
    w3, b3 = prep["w3"], prep["b3"]
    d_in_p, d_mlp_p = w1.shape
    d_out_p = w3.shape[1]

    B, d_in = x.shape
    assert d_in <= d_in_p, "x feature dim larger than prepared w1"
    assert d_out <= d_out_p, "d_out larger than prepared w3"

    # ---- batch tiling -------------------------------------------------------
    if tile_b is None:
        tile_b = _default_tile_b()
    b_ceil = _round_up(B, 16)
    tb = min(tile_b, b_ceil)
    n_steps = -(-b_ceil // tb)
    if n_steps == 1 and b_ceil >= 32:
        n_steps = 2                      # >=2 tiles so both v7x TCs get work
    tb = _round_up(-(-b_ceil // n_steps), 16)
    b_pad = _round_up(B, tb)
    grid_b = b_pad // tb
    n_subtiles = 2 if (tb >= 32 and tb % 16 == 0) else 1

    # ---- VMEM budget / path selection ---------------------------------------
    vmem_cap = _vmem_capacity_bytes()
    weight_buf = 1 if _HAS_BUFFERED else 2
    out_bytes = jnp.dtype(out_dtype).itemsize
    resident = weight_buf * (
        2 * (d_in_p * d_mlp_p + d_mlp_p * d_mlp_p + d_mlp_p * d_out_p)
        + 4 * (2 * d_mlp_p + d_out_p))
    fused_budget = (resident
                    + 2 * tb * d_in_p * 4            # double-buffered x tile (f32)
                    + 2 * tb * d_out_p * out_bytes   # double-buffered out tile
                    + tb * d_mlp_p * 6 * 2           # f32 + bf16 intermediates
                    + 8 * _MIB)                      # compiler scratch headroom
    use_fused = (not force_tiled) and fused_budget <= vmem_cap - 4 * _MIB

    # Pad only what is necessary; x stays f32 (bf16 cast happens in-kernel).
    x_p = _pad_to(x, (b_pad, d_in_p))

    if use_fused:
        vmem_limit = int(min(max(fused_budget, 32 * _MIB),
                             max(vmem_cap - 4 * _MIB, 32 * _MIB)))
        cost = pl.CostEstimate(
            flops=2 * b_pad * (d_in_p * d_mlp_p + d_mlp_p * d_mlp_p
                               + d_mlp_p * d_out_p),
            transcendentals=b_pad * (2 * d_mlp_p + d_out_p),
            bytes_accessed=int(b_pad * d_in_p * 4 + resident // weight_buf
                               + b_pad * d_out_p * out_bytes))
        out = pl.pallas_call(
            functools.partial(_fused_mlp_kernel, n_subtiles=n_subtiles),
            out_shape=jax.ShapeDtypeStruct((b_pad, d_out_p), out_dtype),
            grid_spec=pltpu.PrefetchScalarGridSpec(
                num_scalar_prefetch=0,
                grid=(grid_b,),
                in_specs=[
                    pl.BlockSpec((tb, d_in_p), lambda i: (i, 0)),   # x tile
                    _resident_spec((d_in_p, d_mlp_p)),              # w1
                    _resident_spec((1, d_mlp_p)),                   # b1
                    _resident_spec((d_mlp_p, d_mlp_p)),             # w2
                    _resident_spec((1, d_mlp_p)),                   # b2
                    _resident_spec((d_mlp_p, d_out_p)),             # w3
                    _resident_spec((1, d_out_p)),                   # b3
                ],
                out_specs=pl.BlockSpec((tb, d_out_p), lambda i: (i, 0)),
            ),
            compiler_params=pltpu.CompilerParams(
                dimension_semantics=("parallel",),
                vmem_limit_bytes=vmem_limit),
            cost_estimate=cost,
        )(x_p, w1, b1, w2, b2, w3, b3)
    else:
        # Per-layer tiled fallback: resident weights would not fit per-TC VMEM
        # (e.g. large d_mlp on v7x's 64 MiB/TC).  K is tiled with an f32
        # accumulator; inter-layer activations stay bf16 to halve HBM traffic.
        h = _linear_gelu_tiled(x_p, w1, b1, out_dtype=jnp.bfloat16,
                               tm=tb, vmem_cap=vmem_cap)
        h = _linear_gelu_tiled(h, w2, b2, out_dtype=jnp.bfloat16,
                               tm=tb, vmem_cap=vmem_cap)
        out = _linear_gelu_tiled(h, w3, b3, out_dtype=out_dtype,
                                 tm=tb, vmem_cap=vmem_cap)

    return out[:B, :d_out]


# ----------------------------------------------------------------------------
# Synthetic init + pure-JAX reference + self-test.
# ----------------------------------------------------------------------------
def init_params(key, d_in, d_mlp, d_out, dtype=jnp.float32):
    """Deterministic synthetic init (uniform, like PyTorch Linear default)."""
    ks = jax.random.split(key, 6)

    def lin(kw, kb, fan_in, fan_out):
        bound = 1.0 / (fan_in ** 0.5)
        w = jax.random.uniform(kw, (fan_in, fan_out), dtype, -bound, bound)
        b = jax.random.uniform(kb, (fan_out,), dtype, -bound, bound)
        return w, b

    w1, b1 = lin(ks[0], ks[1], d_in, d_mlp)
    w2, b2 = lin(ks[2], ks[3], d_mlp, d_mlp)
    w3, b3 = lin(ks[4], ks[5], d_mlp, d_out)
    return {"w1": w1, "b1": b1, "w2": w2, "b2": b2, "w3": w3, "b3": b3}


def _reference(x, p):
    h = _gelu_exact(x @ p["w1"] + p["b1"])
    h = _gelu_exact(h @ p["w2"] + p["b2"])
    h = _gelu_exact(h @ p["w3"] + p["b3"])
    return h


if __name__ == "__main__":
    d_in, d_mlp, d_out = 32, 64, 16
    B = 64

    key = jax.random.PRNGKey(0)
    k_x, k_p = jax.random.split(key)

    x = jax.random.normal(k_x, (B, d_in), dtype=jnp.float32)
    params = init_params(k_p, d_in, d_mlp, d_out)
    prep = prepare_params(params)   # one-time pad + bf16 cast of the weights

    ref = _reference(x, params)

    # Fused resident-weights path.
    out = image_encoder_forward(x, prep, d_out=d_out)
    out = jax.block_until_ready(out)
    assert out.shape == (B, d_out)
    max_err = float(jnp.max(jnp.abs(out - ref)))
    # bf16 matmul operands with f32 accumulation -> loosened tolerance vs f32 ref.
    assert jnp.allclose(out, ref, atol=5e-2, rtol=5e-2), (
        f"fused path mismatch vs reference (max abs err {max_err})")

    # Tiled fallback path (used automatically when weights exceed per-TC VMEM).
    out_t = image_encoder_forward(x, prep, d_out=d_out, force_tiled=True)
    out_t = jax.block_until_ready(out_t)
    max_err_t = float(jnp.max(jnp.abs(out_t - ref)))
    assert jnp.allclose(out_t, ref, atol=5e-2, rtol=5e-2), (
        f"tiled path mismatch vs reference (max abs err {max_err_t})")

    print("KERNEL_OK")
</pallas_src>

<mosaic_0001>
module attributes {stable_mosaic.version = 11 : i64} {
  func.func @_fused_mlp_kernel(%arg0: i32, %arg1: memref<32x128xf32, #tpu.memory_space<vmem>>, %arg2: memref<128x128xbf16, #tpu.memory_space<vmem>>, %arg3: memref<1x128xf32, #tpu.memory_space<vmem>>, %arg4: memref<128x128xbf16, #tpu.memory_space<vmem>>, %arg5: memref<1x128xf32, #tpu.memory_space<vmem>>, %arg6: memref<128x128xbf16, #tpu.memory_space<vmem>>, %arg7: memref<1x128xf32, #tpu.memory_space<vmem>>, %arg8: memref<32x128xf32, #tpu.memory_space<vmem>>) attributes {dimension_semantics = [#tpu.dimension_semantics<parallel>], iteration_bounds = array<i64: 2>, scalar_prefetch = 0 : i64, scratch_operands = 0 : i64, tpu.core_type = #tpu.core_type<tc>, window_params = [{transform_indices = @transform_0, window_bounds = array<i64: 32, 128>}, {pipeline_mode = #tpu.pipeline_mode<synchronous>, transform_indices = @transform_1, window_bounds = array<i64: 128, 128>}, {pipeline_mode = #tpu.pipeline_mode<synchronous>, transform_indices = @transform_2, window_bounds = array<i64: 1, 128>}, {pipeline_mode = #tpu.pipeline_mode<synchronous>, transform_indices = @transform_3, window_bounds = array<i64: 128, 128>}, {pipeline_mode = #tpu.pipeline_mode<synchronous>, transform_indices = @transform_4, window_bounds = array<i64: 1, 128>}, {pipeline_mode = #tpu.pipeline_mode<synchronous>, transform_indices = @transform_5, window_bounds = array<i64: 128, 128>}, {pipeline_mode = #tpu.pipeline_mode<synchronous>, transform_indices = @transform_6, window_bounds = array<i64: 1, 128>}, {transform_indices = @transform_7, window_bounds = array<i64: 32, 128>}]} {
    %c0 = arith.constant 0 : index
    %c0_0 = arith.constant 0 : index
    %0 = vector.load %arg1[%c0, %c0_0] : memref<32x128xf32, #tpu.memory_space<vmem>>, vector<16x128xf32>
    %1 = arith.truncf %0 : vector<16x128xf32> to vector<16x128xbf16>
    %c0_1 = arith.constant 0 : index
    %c0_2 = arith.constant 0 : index
    %2 = vector.load %arg2[%c0_1, %c0_2] : memref<128x128xbf16, #tpu.memory_space<vmem>>, vector<128x128xbf16>
    %cst = arith.constant dense<0.000000e+00> : vector<16x128xf32>
    %3 = tpu.matmul %1, %2, %cst {dimension_numbers = #tpu.dot_dimension_numbers<[1], [0], [0], [1], [0, 0, 1, 1], [], []>} : vector<16x128xbf16>, vector<128x128xbf16>, vector<16x128xf32> -> vector<16x128xf32>
    %c0_3 = arith.constant 0 : index
    %c0_4 = arith.constant 0 : index
    %4 = vector.load %arg3[%c0_3, %c0_4] : memref<1x128xf32, #tpu.memory_space<vmem>>, vector<1x128xf32>
    %5 = vector.broadcast %4 : vector<1x128xf32> to vector<16x128xf32>
    %6 = arith.addf %3, %5 : vector<16x128xf32>
    %cst_5 = arith.constant 5.000000e-01 : f32
    %7 = vector.broadcast %cst_5 : f32 to vector<16x128xf32>
    %8 = arith.mulf %7, %6 : vector<16x128xf32>
    %cst_6 = arith.constant 0.707106769 : f32
    %9 = vector.broadcast %cst_6 : f32 to vector<16x128xf32>
    %10 = arith.mulf %6, %9 : vector<16x128xf32>
    %11 = math.erf %10 : vector<16x128xf32>
    %cst_7 = arith.constant 1.000000e+00 : f32
    %12 = vector.broadcast %cst_7 : f32 to vector<16x128xf32>
    %13 = arith.addf %12, %11 : vector<16x128xf32>
    %14 = arith.mulf %8, %13 : vector<16x128xf32>
    %15 = arith.truncf %14 : vector<16x128xf32> to vector<16x128xbf16>
    %c0_8 = arith.constant 0 : index
    %c0_9 = arith.constant 0 : index
    %16 = vector.load %arg4[%c0_8, %c0_9] : memref<128x128xbf16, #tpu.memory_space<vmem>>, vector<128x128xbf16>
    %cst_10 = arith.constant dense<0.000000e+00> : vector<16x128xf32>
    %17 = tpu.matmul %15, %16, %cst_10 {dimension_numbers = #tpu.dot_dimension_numbers<[1], [0], [0], [1], [0, 0, 1, 1], [], []>} : vector<16x128xbf16>, vector<128x128xbf16>, vector<16x128xf32> -> vector<16x128xf32>
    %c0_11 = arith.constant 0 : index
    %c0_12 = arith.constant 0 : index
    %18 = vector.load %arg5[%c0_11, %c0_12] : memref<1x128xf32, #tpu.memory_space<vmem>>, vector<1x128xf32>
    %19 = vector.broadcast %18 : vector<1x128xf32> to vector<16x128xf32>
    %20 = arith.addf %17, %19 : vector<16x128xf32>
    %cst_13 = arith.constant 5.000000e-01 : f32
    %21 = vector.broadcast %cst_13 : f32 to vector<16x128xf32>
    %22 = arith.mulf %21, %20 : vector<16x128xf32>
    %cst_14 = arith.constant 0.707106769 : f32
    %23 = vector.broadcast %cst_14 : f32 to vector<16x128xf32>
    %24 = arith.mulf %20, %23 : vector<16x128xf32>
    %25 = math.erf %24 : vector<16x128xf32>
    %cst_15 = arith.constant 1.000000e+00 : f32
    %26 = vector.broadcast %cst_15 : f32 to vector<16x128xf32>
    %27 = arith.addf %26, %25 : vector<16x128xf32>
    %28 = arith.mulf %22, %27 : vector<16x128xf32>
    %29 = arith.truncf %28 : vector<16x128xf32> to vector<16x128xbf16>
    %c0_16 = arith.constant 0 : index
    %c0_17 = arith.constant 0 : index
    %30 = vector.load %arg6[%c0_16, %c0_17] : memref<128x128xbf16, #tpu.memory_space<vmem>>, vector<128x128xbf16>
    %cst_18 = arith.constant dense<0.000000e+00> : vector<16x128xf32>
    %31 = tpu.matmul %29, %30, %cst_18 {dimension_numbers = #tpu.dot_dimension_numbers<[1], [0], [0], [1], [0, 0, 1, 1], [], []>} : vector<16x128xbf16>, vector<128x128xbf16>, vector<16x128xf32> -> vector<16x128xf32>
    %c0_19 = arith.constant 0 : index
    %c0_20 = arith.constant 0 : index
    %32 = vector.load %arg7[%c0_19, %c0_20] : memref<1x128xf32, #tpu.memory_space<vmem>>, vector<1x128xf32>
    %33 = vector.broadcast %32 : vector<1x128xf32> to vector<16x128xf32>
    %34 = arith.addf %31, %33 : vector<16x128xf32>
    %cst_21 = arith.constant 5.000000e-01 : f32
    %35 = vector.broadcast %cst_21 : f32 to vector<16x128xf32>
    %36 = arith.mulf %35, %34 : vector<16x128xf32>
    %cst_22 = arith.constant 0.707106769 : f32
    %37 = vector.broadcast %cst_22 : f32 to vector<16x128xf32>
    %38 = arith.mulf %34, %37 : vector<16x128xf32>
    %39 = math.erf %38 : vector<16x128xf32>
    %cst_23 = arith.constant 1.000000e+00 : f32
    %40 = vector.broadcast %cst_23 : f32 to vector<16x128xf32>
    %41 = arith.addf %40, %39 : vector<16x128xf32>
    %42 = arith.mulf %36, %41 : vector<16x128xf32>
    %c0_24 = arith.constant 0 : index
    %c0_25 = arith.constant 0 : index
    %43 = vector.load %arg8[%c0_24, %c0_25] : memref<32x128xf32, #tpu.memory_space<vmem>>, vector<16x128xf32>
    tpu.vector_store %arg8[%c0_24, %c0_25], %42 {strides = array<i32>} : memref<32x128xf32, #tpu.memory_space<vmem>>, vector<16x128xf32>,
    %c16 = arith.constant 16 : index
    %c0_26 = arith.constant 0 : index
    %44 = vector.load %arg1[%c16, %c0_26] : memref<32x128xf32, #tpu.memory_space<vmem>>, vector<16x128xf32>
    %45 = arith.truncf %44 : vector<16x128xf32> to vector<16x128xbf16>
    %c0_27 = arith.constant 0 : index
    %c0_28 = arith.constant 0 : index
    %46 = vector.load %arg2[%c0_27, %c0_28] : memref<128x128xbf16, #tpu.memory_space<vmem>>, vector<128x128xbf16>
    %cst_29 = arith.constant dense<0.000000e+00> : vector<16x128xf32>
    %47 = tpu.matmul %45, %46, %cst_29 {dimension_numbers = #tpu.dot_dimension_numbers<[1], [0], [0], [1], [0, 0, 1, 1], [], []>} : vector<16x128xbf16>, vector<128x128xbf16>, vector<16x128xf32> -> vector<16x128xf32>
    %c0_30 = arith.constant 0 : index
    %c0_31 = arith.constant 0 : index
    %48 = vector.load %arg3[%c0_30, %c0_31] : memref<1x128xf32, #tpu.memory_space<vmem>>, vector<1x128xf32>
    %49 = vector.broadcast %48 : vector<1x128xf32> to vector<16x128xf32>
    %50 = arith.addf %47, %49 : vector<16x128xf32>
    %cst_32 = arith.constant 5.000000e-01 : f32
    %51 = vector.broadcast %cst_32 : f32 to vector<16x128xf32>
    %52 = arith.mulf %51, %50 : vector<16x128xf32>
    %cst_33 = arith.constant 0.707106769 : f32
    %53 = vector.broadcast %cst_33 : f32 to vector<16x128xf32>
    %54 = arith.mulf %50, %53 : vector<16x128xf32>
    %55 = math.erf %54 : vector<16x128xf32>
    %cst_34 = arith.constant 1.000000e+00 : f32
    %56 = vector.broadcast %cst_34 : f32 to vector<16x128xf32>
    %57 = arith.addf %56, %55 : vector<16x128xf32>
    %58 = arith.mulf %52, %57 : vector<16x128xf32>
    %59 = arith.truncf %58 : vector<16x128xf32> to vector<16x128xbf16>
    %c0_35 = arith.constant 0 : index
    %c0_36 = arith.constant 0 : index
    %60 = vector.load %arg4[%c0_35, %c0_36] : memref<128x128xbf16, #tpu.memory_space<vmem>>, vector<128x128xbf16>
    %cst_37 = arith.constant dense<0.000000e+00> : vector<16x128xf32>
    %61 = tpu.matmul %59, %60, %cst_37 {dimension_numbers = #tpu.dot_dimension_numbers<[1], [0], [0], [1], [0, 0, 1, 1], [], []>} : vector<16x128xbf16>, vector<128x128xbf16>, vector<16x128xf32> -> vector<16x128xf32>
    %c0_38 = arith.constant 0 : index
    %c0_39 = arith.constant 0 : index
    %62 = vector.load %arg5[%c0_38, %c0_39] : memref<1x128xf32, #tpu.memory_space<vmem>>, vector<1x128xf32>
    %63 = vector.broadcast %62 : vector<1x128xf32> to vector<16x128xf32>
    %64 = arith.addf %61, %63 : vector<16x128xf32>
    %cst_40 = arith.constant 5.000000e-01 : f32
    %65 = vector.broadcast %cst_40 : f32 to vector<16x128xf32>
    %66 = arith.mulf %65, %64 : vector<16x128xf32>
    %cst_41 = arith.constant 0.707106769 : f32
    %67 = vector.broadcast %cst_41 : f32 to vector<16x128xf32>
    %68 = arith.mulf %64, %67 : vector<16x128xf32>
    %69 = math.erf %68 : vector<16x128xf32>
    %cst_42 = arith.constant 1.000000e+00 : f32
    %70 = vector.broadcast %cst_42 : f32 to vector<16x128xf32>
    %71 = arith.addf %70, %69 : vector<16x128xf32>
    %72 = arith.mulf %66, %71 : vector<16x128xf32>
    %73 = arith.truncf %72 : vector<16x128xf32> to vector<16x128xbf16>
    %c0_43 = arith.constant 0 : index
    %c0_44 = arith.constant 0 : index
    %74 = vector.load %arg6[%c0_43, %c0_44] : memref<128x128xbf16, #tpu.memory_space<vmem>>, vector<128x128xbf16>
    %cst_45 = arith.constant dense<0.000000e+00> : vector<16x128xf32>
    %75 = tpu.matmul %73, %74, %cst_45 {dimension_numbers = #tpu.dot_dimension_numbers<[1], [0], [0], [1], [0, 0, 1, 1], [], []>} : vector<16x128xbf16>, vector<128x128xbf16>, vector<16x128xf32> -> vector<16x128xf32>
    %c0_46 = arith.constant 0 : index
    %c0_47 = arith.constant 0 : index
    %76 = vector.load %arg7[%c0_46, %c0_47] : memref<1x128xf32, #tpu.memory_space<vmem>>, vector<1x128xf32>
    %77 = vector.broadcast %76 : vector<1x128xf32> to vector<16x128xf32>
    %78 = arith.addf %75, %77 : vector<16x128xf32>
    %cst_48 = arith.constant 5.000000e-01 : f32
    %79 = vector.broadcast %cst_48 : f32 to vector<16x128xf32>
    %80 = arith.mulf %79, %78 : vector<16x128xf32>
    %cst_49 = arith.constant 0.707106769 : f32
    %81 = vector.broadcast %cst_49 : f32 to vector<16x128xf32>
    %82 = arith.mulf %78, %81 : vector<16x128xf32>
    %83 = math.erf %82 : vector<16x128xf32>
    %cst_50 = arith.constant 1.000000e+00 : f32
    %84 = vector.broadcast %cst_50 : f32 to vector<16x128xf32>
    %85 = arith.addf %84, %83 : vector<16x128xf32>
    %86 = arith.mulf %80, %85 : vector<16x128xf32>
    %c16_51 = arith.constant 16 : index
    %c0_52 = arith.constant 0 : index
    %87 = vector.load %arg8[%c16_51, %c0_52] : memref<32x128xf32, #tpu.memory_space<vmem>>, vector<16x128xf32>
    tpu.vector_store %arg8[%c16_51, %c0_52], %86 {strides = array<i32>} : memref<32x128xf32, #tpu.memory_space<vmem>>, vector<16x128xf32>,
    return
  }
  func.func @transform_0(%arg0: i32) -> (i32, i32) {
    %c0_i32 = arith.constant 0 : i32
    %c0_i32_0 = arith.constant 0 : i32
    return %arg0, %c0_i32 : i32, i32
  }
  func.func @transform_1(%arg0: i32) -> (i32, i32) {
    %c0_i32 = arith.constant 0 : i32
    %c0_i32_0 = arith.constant 0 : i32
    %c0_i32_1 = arith.constant 0 : i32
    return %c0_i32, %c0_i32_0 : i32, i32
  }
  func.func @transform_2(%arg0: i32) -> (i32, i32) {
    %c0_i32 = arith.constant 0 : i32
    %c0_i32_0 = arith.constant 0 : i32
    %c0_i32_1 = arith.constant 0 : i32
    return %c0_i32, %c0_i32_0 : i32, i32
  }
  func.func @transform_3(%arg0: i32) -> (i32, i32) {
    %c0_i32 = arith.constant 0 : i32
    %c0_i32_0 = arith.constant 0 : i32
    %c0_i32_1 = arith.constant 0 : i32
    return %c0_i32, %c0_i32_0 : i32, i32
  }
  func.func @transform_4(%arg0: i32) -> (i32, i32) {
    %c0_i32 = arith.constant 0 : i32
    %c0_i32_0 = arith.constant 0 : i32
    %c0_i32_1 = arith.constant 0 : i32
    return %c0_i32, %c0_i32_0 : i32, i32
  }
  func.func @transform_5(%arg0: i32) -> (i32, i32) {
    %c0_i32 = arith.constant 0 : i32
    %c0_i32_0 = arith.constant 0 : i32
    %c0_i32_1 = arith.constant 0 : i32
    return %c0_i32, %c0_i32_0 : i32, i32
  }
  func.func @transform_6(%arg0: i32) -> (i32, i32) {
    %c0_i32 = arith.constant 0 : i32
    %c0_i32_0 = arith.constant 0 : i32
    %c0_i32_1 = arith.constant 0 : i32
    return %c0_i32, %c0_i32_0 : i32, i32
  }
  func.func @transform_7(%arg0: i32) -> (i32, i32) {
    %c0_i32 = arith.constant 0 : i32
    %c0_i32_0 = arith.constant 0 : i32
    return %arg0, %c0_i32 : i32, i32
  }
}

</mosaic_0001>

<bundles_post_ra>
// kernel: image_encoder_forward.1
= control target key start
LH: loop header
LB: loop body
LE: loop exit
PB: predicated region body
PF: predicated region fallthrough
CT: control target
= control target key end

     0   :  { %s1456_s24 = smov 0   ;;  %s1717_s0 = inlined_call_operand.vmem [shape: f32[64,128], index: 0, kind: input, shape index: {}]   ;;  %s1718_s1 = inlined_call_operand.vmem [shape: bf16[128,128], index: 1, kind: input, shape index: {}]   ;;  %s1719_s2 = inlined_call_operand.vmem [shape: f32[1,128], index: 2, kind: input, shape index: {}]   ;;  %s1720_s3 = inlined_call_operand.vmem [shape: bf16[128,128], index: 3, kind: input, shape index: {}]   ;;  %s1721_s4 = inlined_call_operand.vmem [shape: f32[1,128], index: 4, kind: input, shape index: {}]   ;;  %s1722_s5 = inlined_call_operand.vmem [shape: bf16[128,128], index: 5, kind: input, shape index: {}]   ;;  %s1723_s6 = inlined_call_operand.vmem [shape: f32[1,128], index: 6, kind: input, shape index: {}]   ;;  %s1724_s7 = inlined_call_operand.vmem [shape: f32[64,128], index: 7, kind: output, shape index: {}]  }
   0x1 LB: > { %s1085_s25 = sadd.s32 4294967295, %s1412_s24   ;;  %p1089_p0 = scmp.ge.s32.totalorder %s1412_s24, 1  ;;  %s1412_s24 = sphi %s1456_s24, %s17_s24  }
   0x2   : > { %p238_p1 = scmp.lt.s32.totalorder %s1412_s24, 3 }
   0x4   : > { %p239_p2 = pnand %p1089_p0, %p238_p1 }
   0x5   : > { %v1334_v0 = vld [vmem:[%s1718_s1] sm:$0xff] (!%p239_p2)   ;;  %v1414_v1 = vmov (!%p239_p2), 0.0   ;;  %v1335_v2 = vld [vmem:[%s1718_s1 + $0x8] sm:$0xff] (!%p239_p2)   ;;  %vm1415_vm0 = vmmov (!%p239_p2), 0   ;;  %s1090_s30 = sshll.u32 (!%p239_p2), %s1085_s25, 2  ;;  %v1336_v3 = vld [vmem:[%s1718_s1 + $0x10] sm:$0xff] (!%p239_p2)  }
   0x6   : > { %242 = sbr.rel (%p239_p2) target bundleno = 1009 (0x3f1), region = 48  ;;  %1204 = vmatprep.subr.bf16.mxu0 (!%p239_p2), %v1414_v1  ;;  %1224 = vmatprep.subr.bf16.mxu1 (!%p239_p2), %v1414_v1  ;;  %p271_p3 = scmp.lt.s32.totalorder (!%p239_p2), %s1090_s30, 7  ;;  %v1342_v4 = vld [vmem:[%s1720_s3] sm:$0xff] (!%p239_p2)   ;;  %v1337_v5 = vld [vmem:[%s1718_s1 + $0x18] sm:$0xff] (!%p239_p2)   ;;  %v1343_v6 = vld [vmem:[%s1720_s3 + $0x8] sm:$0xff] (!%p239_p2)  }
   0x7   : > { %1205 = vmatpush3.bf16.msra.mxu0 (!%p239_p2), %v1334_v0  ;;  %1220 = vmatprep.mubr.msk.bf16.mxu0 (!%p239_p2), %vm1415_vm0, %v1414_v1  ;;  %v1338_v7 = vld [vmem:[%s1718_s1 + $0x20] sm:$0xff] (!%p239_p2)   ;;  %v1339_v8 = vld [vmem:[%s1718_s1 + $0x28] sm:$0xff] (!%p239_p2)   ;;  %v1340_v9 = vld [vmem:[%s1718_s1 + $0x30] sm:$0xff] (!%p239_p2)  }
   0x8   : > { %1206 = vmatprep.subr.bf16.mxu0 (!%p239_p2), %v1414_v1  ;;  %1240 = vmatprep.mubr.msk.bf16.mxu1 (!%p239_p2), %vm1415_vm0, %v1414_v1  ;;  %v1341_v10 = vld [vmem:[%s1718_s1 + $0x38] sm:$0xff] (!%p239_p2)   ;;  %v1344_v14 = vld [vmem:[%s1720_s3 + $0x10] sm:$0xff] (!%p239_p2)   ;;  %v1346_v16 = vld [vmem:[%s1720_s3 + $0x20] sm:$0xff] (!%p239_p2)  }
   0x9   : > { %1225 = vmatpush3.bf16.msra.mxu1 (!%p239_p2), %v1342_v4  ;;  %v1345_v15 = vld [vmem:[%s1720_s3 + $0x18] sm:$0xff] (!%p239_p2)   ;;  %v1347_v17 = vld [vmem:[%s1720_s3 + $0x28] sm:$0xff] (!%p239_p2)   ;;  %v1348_v18 = vld [vmem:[%s1720_s3 + $0x30] sm:$0xff] (!%p239_p2)  }
   0xa   : > { %1226 = vmatprep.subr.bf16.mxu1 (!%p239_p2), %v1414_v1  ;;  %v1349_v19 = vld [vmem:[%s1720_s3 + $0x38] sm:$0xff] (!%p239_p2)   ;;  %v1358_v20 = vld [vmem:[%s1722_s5] sm:$0xff] (!%p239_p2)   ;;  %v1359_v21 = vld [vmem:[%s1722_s5 + $0x8] sm:$0xff] (!%p239_p2)  }
   0xb   : > { %1207 = vmatpush3.bf16.msra.mxu0 (!%p239_p2), %v1335_v2  ;;  %v1559_v22 = vld [vmem:[%s1719_s2] ss:$0 sm:$0xff] (!%p239_p2)  ;;  %v1351_v41 = vld [vmem:[%s1718_s1 + $0x8] sm:$0xff] (!%p239_p2)   ;;  %v1352_v42 = vld [vmem:[%s1718_s1 + $0x10] sm:$0xff] (!%p239_p2)  }
   0xc   : > { %1208 = vmatprep.subr.bf16.mxu0 (!%p239_p2), %v1414_v1  ;;  %v1350_v39 = vld [vmem:[%s1718_s1] sm:$0xff] (!%p239_p2)   ;;  %v1353_v43 = vld [vmem:[%s1718_s1 + $0x18] sm:$0xff] (!%p239_p2)   ;;  %v1355_v45 = vld [vmem:[%s1718_s1 + $0x28] sm:$0xff] (!%p239_p2)  }
   0xd   : > { %s1726_s30 = smov (!%p271_p3, %s1090_s30), 7  ;;  %1227 = vmatpush3.bf16.msra.mxu1 %v1343_v6  ;;  %v1354_v44 = vld [vmem:[%s1718_s1 + $0x20] sm:$0xff]   ;;  %v1356_v46 = vld [vmem:[%s1718_s1 + $0x30] sm:$0xff]   ;;  %v1357_v47 = vld [vmem:[%s1718_s1 + $0x38] sm:$0xff]  }
   0xe   : > { %s1091_s14 = sshll.u32 %s1726_s30, 3  ;;  %1228 = vmatprep.subr.bf16.mxu1 %v1414_v1  ;;  %v1360_v51 = vld [vmem:[%s1722_s5 + $0x10] sm:$0xff]   ;;  %v1361_v52 = vld [vmem:[%s1722_s5 + $0x18] sm:$0xff]   ;;  %v1362_v53 = vld [vmem:[%s1722_s5 + $0x20] sm:$0xff]  }
   0xf   : > { %1209 = vmatpush3.bf16.msra.mxu0 %v1336_v3  ;;  %s1512_s26 = scalar_lea.vmem %s1717_s0, %s1091_s14  ;;  %v1363_v54 = vld [vmem:[%s1722_s5 + $0x28] sm:$0xff]   ;;  %v1364_v55 = vld [vmem:[%s1722_s5 + $0x30] sm:$0xff]   ;;  %v1365_v56 = vld [vmem:[%s1722_s5 + $0x38] sm:$0xff]   ;;  %s1706_s12 = scalar_lea.vmem %s1724_s7, %s1091_s14 }
  0x10   : > { %1210 = vmatprep.subr.bf16.mxu0 %v1414_v1  ;;  %v283_v11 = vld [vmem:[%s1512_s26] sm:$0xff]  ;;  %v284_v12 = vld [vmem:[%s1512_s26 + $0x8] sm:$0xff]  ;;  %v656_v48 = vld [vmem:[%s1512_s26 + $0x10] sm:$0xff] }
  0x11   : > { %v285_v13 = vpack.c.bf16 %v284_v12, %v283_v11  ;;  %1229 = vmatpush3.bf16.msra.mxu1 %v1344_v14  ;;  %v657_v49 = vld [vmem:[%s1512_s26 + $0x18] sm:$0xff]  ;;  %v1628_v57 = vld [vmem:[%s1721_s4] ss:$0 sm:$0xff]  ;;  %v1368_v14 = vld [vmem:[%s1720_s3 + $0x10] sm:$0xff]  }
  0x12   : > { %1230 = vmatprep.subr.bf16.mxu1 %v1414_v1  ;;  %v658_v50 = vpack.c.bf16 %v657_v49, %v656_v48  ;;  %v1366_v11 = vld [vmem:[%s1720_s3] sm:$0xff]  }
  0x13   : > { %1211 = vmatpush3.bf16.msra.mxu0 %v1337_v5 }
  0x14   : > { %1212 = vmatprep.subr.bf16.mxu0 %v1414_v1 }
  0x15   : > { %1231 = vmatpush3.bf16.msra.mxu1 %v1345_v15 }
  0x16   : > { %1232 = vmatprep.subr.bf16.mxu1 %v1414_v1 }
  0x17   : > { %1213 = vmatpush3.bf16.msra.mxu0 %v1338_v7 }
  0x18   : > { %1214 = vmatprep.subr.bf16.mxu0 %v1414_v1 }
  0x19   : > { %1233 = vmatpush3.bf16.msra.mxu1 %v1346_v16 }
  0x1a   : > { %1234 = vmatprep.subr.bf16.mxu1 %v1414_v1 }
  0x1b   : > { %1215 = vmatpush3.bf16.msra.mxu0 %v1339_v8 }
  0x1c   : > { %1216 = vmatprep.subr.bf16.mxu0 %v1414_v1 }
  0x1d   : > { %1235 = vmatpush3.bf16.msra.mxu1 %v1347_v17 }
  0x1e   : > { %1236 = vmatprep.subr.bf16.mxu1 %v1414_v1 }
  0x1f   : > { %1217 = vmatpush3.bf16.msra.mxu0 %v1340_v9 }
  0x20   : > { %1218 = vmatprep.subr.bf16.mxu0 %v1414_v1 }
  0x21   : > { %1237 = vmatpush3.bf16.msra.mxu1 %v1348_v18  ;;  %v1369_v18 = vld [vmem:[%s1720_s3 + $0x18] sm:$0xff]  }
  0x22   : > { %1238 = vmatprep.subr.bf16.mxu1 %v1414_v1 }
  0x23   : > { %1219 = vmatpush3.bf16.msra.mxu0 %v1341_v10 }
  0x24   : > { %1244 = vmatprep.subr.bf16.mxu0 %v1414_v1 }
  0x25   : > { %1239 = vmatpush3.bf16.msra.mxu1 %v1349_v19 }
  0x26   : > { %1221 = vmatmul.mubr.bf16.vlgmr.msra.gmra.mrb[0].mxu0 %v285_v13  ;;  %1264 = vmatprep.subr.bf16.mxu1 %v1414_v1  ;;  %v1367_v13 = vld [vmem:[%s1720_s3 + $0x8] sm:$0xff]  }
  0x27   : > { %1260 = vmatprep.mubr.msk.bf16.mxu0 %vm1415_vm0, %v1414_v1  ;;  %1245 = vmatpush3.bf16.msra.mxu0 %v1358_v20 }
  0x28   : > { %1246 = vmatprep.subr.bf16.mxu0 %v1414_v1 }
  0x2b   : > { %1247 = vmatpush3.bf16.msra.mxu0 %v1359_v21 }
  0x2c   : > { %1248 = vmatprep.subr.bf16.mxu0 %v1414_v1 }
  0x2f   : > { %1249 = vmatpush3.bf16.msra.mxu0 %v1360_v51 }
  0x30   : > { %1250 = vmatprep.subr.bf16.mxu0 %v1414_v1 }
  0x33   : > { %1251 = vmatpush3.bf16.msra.mxu0 %v1361_v52 }
  0x34   : > { %1252 = vmatprep.subr.bf16.mxu0 %v1414_v1 }
  0x37   : > { %1253 = vmatpush3.bf16.msra.mxu0 %v1362_v53 }
  0x38   : > { %1254 = vmatprep.subr.bf16.mxu0 %v1414_v1 }
  0x3b   : > { %1255 = vmatpush3.bf16.msra.mxu0 %v1363_v54 }
  0x3c   : > { %1256 = vmatprep.subr.bf16.mxu0 %v1414_v1 }
  0x3f   : > { %1257 = vmatpush3.bf16.msra.mxu0 %v1364_v55 }
  0x40   : > { %1258 = vmatprep.subr.bf16.mxu0 %v1414_v1 }
  0x43   : > { %1259 = vmatpush3.bf16.msra.mxu0 %v1365_v56 }
  0x44   : > { %1284 = vmatprep.subr.bf16.mxu0 %v1414_v1 }
  0xf9   : > { %v391_v23 = vpop.f32.mrb[0].mxu0 }
  0xfa   : > { %v392_v24 = vadd.f32 %v1559_v22, %v391_v23  ;;  %v1222_v25 = vpop.f32.mrb[1].mxu0 }
  0xfb   : > { %v394_v26 = vpop.f32.mrb[2].mxu0  ;;  %v1370_v25 = vld [vmem:[%s1720_s3 + $0x20] sm:$0xff]  }
  0xfc   : > { %v400_v27 = vmul.f32 0.70710677, %v392_v24  ;;  %v395_v28 = vadd.f32 %v1559_v22, %v394_v26  ;;  %v1223_v29 = vpop.f32.mrb[3].mxu0  ;;  %v398_v34 = vmul.f32 0.5, %v392_v24  ;;  %v1371_v26 = vld [vmem:[%s1720_s3 + $0x28] sm:$0xff]  }
  0xfe   : > { %1382 = verf.f32 %v400_v27  ;;  %v401_v30 = vmul.f32 0.70710677, %v395_v28  ;;  %v399_v35 = vmul.f32 0.5, %v395_v28 }
 0x100   : > { %1384 = verf.f32 %v401_v30  ;;  %v1373_v30 = vld [vmem:[%s1720_s3 + $0x38] sm:$0xff]  }
 0x108   : > { %v1383_v31 = vpop.eup %1382 }
 0x109   : > { %v404_v32 = vadd.f32 1.0, %v1383_v31 }
 0x10a   : > { %v1385_v33 = vpop.eup %1384 }
 0x10b   : > { %v405_v36 = vadd.f32 1.0, %v1385_v33  ;;  %v406_v37 = vmul.f32 %v404_v32, %v398_v34 }
 0x10d   : > { %v407_v38 = vmul.f32 %v405_v36, %v399_v35 }
 0x10f   : > { %v408_v40 = vpack.c.bf16 %v407_v38, %v406_v37  ;;  %v1374_v37 = vld [vmem:[%s1722_s5] sm:$0xff]   ;;  %v1375_v38 = vld [vmem:[%s1722_s5 + $0x8] sm:$0xff]  }
 0x111   : > { %1241 = vmatmul.mubr.bf16.vlgmr.msra.gmra.mrb[0].mxu1 %v408_v40  ;;  %v1377_v40 = vld [vmem:[%s1722_s5 + $0x18] sm:$0xff]  }
 0x112   : > { %1265 = vmatpush3.bf16.msra.mxu1 %v1350_v39  ;;  %1280 = vmatprep.mubr.msk.bf16.mxu1 %vm1415_vm0, %v1414_v1  ;;  %v1376_v39 = vld [vmem:[%s1722_s5 + $0x10] sm:$0xff]  }
 0x113   : > { %1266 = vmatprep.subr.bf16.mxu1 %v1414_v1 }
 0x116   : > { %1267 = vmatpush3.bf16.msra.mxu1 %v1351_v41  ;;  %v1378_v41 = vld [vmem:[%s1722_s5 + $0x20] sm:$0xff]  }
 0x117   : > { %1268 = vmatprep.subr.bf16.mxu1 %v1414_v1 }
 0x11a   : > { %1269 = vmatpush3.bf16.msra.mxu1 %v1352_v42  ;;  %v1379_v42 = vld [vmem:[%s1722_s5 + $0x28] sm:$0xff]  }
 0x11b   : > { %1270 = vmatprep.subr.bf16.mxu1 %v1414_v1 }
 0x11e   : > { %1271 = vmatpush3.bf16.msra.mxu1 %v1353_v43  ;;  %v1380_v43 = vld [vmem:[%s1722_s5 + $0x30] sm:$0xff]  }
 0x11f   : > { %1272 = vmatprep.subr.bf16.mxu1 %v1414_v1 }
 0x122   : > { %1273 = vmatpush3.bf16.msra.mxu1 %v1354_v44  ;;  %v1381_v44 = vld [vmem:[%s1722_s5 + $0x38] sm:$0xff]  }
 0x123   : > { %1274 = vmatprep.subr.bf16.mxu1 %v1414_v1 }
 0x126   : > { %1275 = vmatpush3.bf16.msra.mxu1 %v1355_v45  ;;  %v1112_v45 = vld [vmem:[%s1723_s6] ss:$0 sm:$0xff] }
 0x127   : > { %1276 = vmatprep.subr.bf16.mxu1 %v1414_v1 }
 0x12a   : > { %1277 = vmatpush3.bf16.msra.mxu1 %v1356_v46 }
 0x12b   : > { %1278 = vmatprep.subr.bf16.mxu1 %v1414_v1 }
 0x12e   : > { %1279 = vmatpush3.bf16.msra.mxu1 %v1357_v47 }
 0x12f   : > { %1304 = vmatprep.subr.bf16.mxu1 %v1414_v1 }
 0x131   : > { %1281 = vmatmul.mubr.bf16.vlgmr.msra.gmra.mrb[4].mxu1 %v658_v50 }
 0x132   : > { %1320 = vmatprep.mubr.msk.bf16.mxu1 %vm1415_vm0, %v1414_v1  ;;  %1305 = vmatpush3.bf16.msra.mxu1 %v1374_v37 }
 0x133   : > { %1306 = vmatprep.subr.bf16.mxu1 %v1414_v1 }
 0x136   : > { %1307 = vmatpush3.bf16.msra.mxu1 %v1375_v38 }
 0x137   : > { %1308 = vmatprep.subr.bf16.mxu1 %v1414_v1 }
 0x13a   : > { %1309 = vmatpush3.bf16.msra.mxu1 %v1376_v39 }
 0x13b   : > { %1310 = vmatprep.subr.bf16.mxu1 %v1414_v1 }
 0x13e   : > { %1311 = vmatpush3.bf16.msra.mxu1 %v1377_v40 }
 0x13f   : > { %1312 = vmatprep.subr.bf16.mxu1 %v1414_v1 }
 0x142   : > { %1313 = vmatpush3.bf16.msra.mxu1 %v1378_v41 }
 0x143   : > { %1314 = vmatprep.subr.bf16.mxu1 %v1414_v1 }
 0x146   : > { %1315 = vmatpush3.bf16.msra.mxu1 %v1379_v42 }
 0x147   : > { %1316 = vmatprep.subr.bf16.mxu1 %v1414_v1 }
 0x14a   : > { %1317 = vmatpush3.bf16.msra.mxu1 %v1380_v43 }
 0x14b   : > { %1318 = vmatprep.subr.bf16.mxu1 %v1414_v1 }
 0x14e   : > { %1319 = vmatpush3.bf16.msra.mxu1 %v1381_v44 }
 0x1e4   : > { %v514_v58 = vpop.f32.mrb[0].mxu1 }
 0x1e5   : > { %v515_v59 = vadd.f32 %v1628_v57, %v514_v58  ;;  %v1242_v60 = vpop.f32.mrb[1].mxu1 }
 0x1e6   : > { %v517_v61 = vpop.f32.mrb[2].mxu1 }
 0x1e7   : > { %v523_v62 = vmul.f32 0.70710677, %v515_v59  ;;  %v518_v63 = vadd.f32 %v1628_v57, %v517_v61  ;;  %v1243_v0 = vpop.f32.mrb[3].mxu1  ;;  %v521_v6 = vmul.f32 0.5, %v515_v59 }
 0x1e9   : > { %1386 = verf.f32 %v523_v62  ;;  %v524_v2 = vmul.f32 0.70710677, %v518_v63  ;;  %v522_v7 = vmul.f32 0.5, %v518_v63 }
 0x1eb   : > { %1388 = verf.f32 %v524_v2 }
 0x1f3   : > { %v1387_v3 = vpop.eup %1386 }
 0x1f4   : > { %v527_v4 = vadd.f32 1.0, %v1387_v3 }
 0x1f5   : > { %v1389_v5 = vpop.eup %1388 }
 0x1f6   : > { %v528_v8 = vadd.f32 1.0, %v1389_v5  ;;  %v529_v9 = vmul.f32 %v527_v4, %v521_v6 }
 0x1f8   : > { %v530_v10 = vmul.f32 %v528_v8, %v522_v7 }
 0x1fa   : > { %v531_v12 = vpack.c.bf16 %v530_v10, %v529_v9 }
 0x1fc   : > { %1261 = vmatmul.mubr.bf16.vlgmr.msra.gmra.mrb[4].mxu0 %v531_v12 }
 0x1fd   : > { %1285 = vmatpush3.bf16.msra.mxu0 %v1366_v11  ;;  %1300 = vmatprep.mubr.msk.bf16.mxu0 %vm1415_vm0, %v1414_v1 }
 0x1fe   : > { %1286 = vmatprep.subr.bf16.mxu0 %v1414_v1 }
 0x201   : > { %1287 = vmatpush3.bf16.msra.mxu0 %v1367_v13 }
 0x202   : > { %1288 = vmatprep.subr.bf16.mxu0 %v1414_v1 }
 0x204   : > { %v764_v15 = vpop.f32.mrb[4].mxu1 }
 0x205   : > { %v765_v16 = vadd.f32 %v1559_v22, %v764_v15  ;;  %v1282_v17 = vpop.f32.mrb[5].mxu1  ;;  %1289 = vmatpush3.bf16.msra.mxu0 %v1368_v14 }
 0x206   : > { %v767_v19 = vpop.f32.mrb[6].mxu1  ;;  %1290 = vmatprep.subr.bf16.mxu0 %v1414_v1 }
 0x207   : > { %v773_v20 = vmul.f32 0.70710677, %v765_v16  ;;  %v768_v21 = vadd.f32 %v1559_v22, %v767_v19  ;;  %v1283_v23 = vpop.f32.mrb[7].mxu1  ;;  %v1372_v22 = vld [vmem:[%s1720_s3 + $0x30] sm:$0xff]   ;;  %v771_v31 = vmul.f32 0.5, %v765_v16 }
 0x209   : > { %1390 = verf.f32 %v773_v20  ;;  %v774_v24 = vmul.f32 0.70710677, %v768_v21  ;;  %1291 = vmatpush3.bf16.msra.mxu0 %v1369_v18  ;;  %v772_v32 = vmul.f32 0.5, %v768_v21 }
 0x20a   : > { %1292 = vmatprep.subr.bf16.mxu0 %v1414_v1 }
 0x20b   : > { %1392 = verf.f32 %v774_v24 }
 0x20d   : > { %1293 = vmatpush3.bf16.msra.mxu0 %v1370_v25 }
 0x20e   : > { %1294 = vmatprep.subr.bf16.mxu0 %v1414_v1 }
 0x211   : > { %1295 = vmatpush3.bf16.msra.mxu0 %v1371_v26 }
 0x212   : > { %1296 = vmatprep.subr.bf16.mxu0 %v1414_v1 }
 0x213   : > { %v1391_v27 = vpop.eup %1390 }
 0x214   : > { %v777_v28 = vadd.f32 1.0, %v1391_v27 }
 0x215   : > { %v1393_v29 = vpop.eup %1392  ;;  %1297 = vmatpush3.bf16.msra.mxu0 %v1372_v22 }
 0x216   : > { %v778_v33 = vadd.f32 1.0, %v1393_v29  ;;  %1298 = vmatprep.subr.bf16.mxu0 %v1414_v1  ;;  %v779_v34 = vmul.f32 %v777_v28, %v771_v31 }
 0x218   : > { %v780_v35 = vmul.f32 %v778_v33, %v772_v32 }
 0x219   : > { %1299 = vmatpush3.bf16.msra.mxu0 %v1373_v30 }
 0x21a   : > { %v781_v36 = vpack.c.bf16 %v780_v35, %v779_v34 }
 0x21c   : > { %1301 = vmatmul.mubr.bf16.vlgmr.msra.gmra.mrb[8].mxu0 %v781_v36 }
 0x2cf   : > { %v637_v46 = vpop.f32.mrb[4].mxu0 }
 0x2d0   : > { %v638_v47 = vadd.f32 %v1112_v45, %v637_v46  ;;  %v1262_v48 = vpop.f32.mrb[5].mxu0 }
 0x2d1   : > { %v640_v49 = vpop.f32.mrb[6].mxu0 }
 0x2d2   : > { %v646_v50 = vmul.f32 0.70710677, %v638_v47  ;;  %v641_v51 = vadd.f32 %v1112_v45, %v640_v49  ;;  %v1263_v52 = vpop.f32.mrb[7].mxu0  ;;  %v644_v54 = vmul.f32 0.5, %v638_v47 }
 0x2d4   : > { %1394 = verf.f32 %v646_v50  ;;  %v647_v53 = vmul.f32 0.70710677, %v641_v51  ;;  %v645_v59 = vmul.f32 0.5, %v641_v51 }
 0x2d6   : > { %1396 = verf.f32 %v647_v53 }
 0x2de   : > { %v1395_v1 = vpop.eup %1394 }
 0x2df   : > { %v650_v55 = vadd.f32 1.0, %v1395_v1 }
 0x2e0   : > { %v1397_v56 = vpop.eup %1396 }
 0x2e1   : > { %v652_v58 = vmul.f32 %v650_v55, %v644_v54  ;;  %v651_v60 = vadd.f32 1.0, %v1397_v56 }
 0x2e3   : > { %654 = vst [vmem:[%s1706_s12] sm:$0xff] %v652_v58  ;;  %v653_v61 = vmul.f32 %v651_v60, %v645_v59 }
 0x2e5   : > { %655 = vst [vmem:[%s1706_s12 + $0x8] sm:$0xff] %v653_v61 }
 0x2ef   : > { %v887_v62 = vpop.f32.mrb[8].mxu0 }
 0x2f0   : > { %v888_v63 = vadd.f32 %v1628_v57, %v887_v62  ;;  %v1302_v0 = vpop.f32.mrb[9].mxu0 }
 0x2f1   : > { %v890_v2 = vpop.f32.mrb[10].mxu0 }
 0x2f2   : > { %v896_v3 = vmul.f32 0.70710677, %v888_v63  ;;  %v891_v4 = vadd.f32 %v1628_v57, %v890_v2  ;;  %v1303_v5 = vpop.f32.mrb[11].mxu0  ;;  %v894_v10 = vmul.f32 0.5, %v888_v63 }
 0x2f4   : > { %1398 = verf.f32 %v896_v3  ;;  %v897_v6 = vmul.f32 0.70710677, %v891_v4  ;;  %v895_v11 = vmul.f32 0.5, %v891_v4 }
 0x2f6   : > { %1400 = verf.f32 %v897_v6 }
 0x2fe   : > { %v1399_v7 = vpop.eup %1398 }
 0x2ff   : > { %v900_v8 = vadd.f32 1.0, %v1399_v7 }
 0x300   : > { %v1401_v9 = vpop.eup %1400 }
 0x301   : > { %v901_v12 = vadd.f32 1.0, %v1401_v9  ;;  %v902_v13 = vmul.f32 %v900_v8, %v894_v10 }
 0x303   : > { %v903_v14 = vmul.f32 %v901_v12, %v895_v11 }
 0x305   : > { %v904_v15 = vpack.c.bf16 %v903_v14, %v902_v13 }
 0x307   : > { %1321 = vmatmul.mubr.bf16.vlgmr.msra.gmra.mrb[8].mxu1 %v904_v15 }
 0x3da   : > { %v1010_v16 = vpop.f32.mrb[8].mxu1 }
 0x3db   : > { %v1011_v17 = vadd.f32 %v1112_v45, %v1010_v16  ;;  %v1322_v18 = vpop.f32.mrb[9].mxu1 }
 0x3dc   : > { %v1013_v19 = vpop.f32.mrb[10].mxu1 }
 0x3dd   : > { %v1019_v57 = vmul.f32 0.70710677, %v1011_v17  ;;  %v1014_v20 = vadd.f32 %v1112_v45, %v1013_v19  ;;  %v1323_v21 = vpop.f32.mrb[11].mxu1  ;;  %v1017_v25 = vmul.f32 0.5, %v1011_v17 }
 0x3df   : > { %1402 = verf.f32 %v1019_v57  ;;  %v1020_v23 = vmul.f32 0.70710677, %v1014_v20  ;;  %v1018_v28 = vmul.f32 0.5, %v1014_v20 }
 0x3e1   : > { %1404 = verf.f32 %v1020_v23 }
 0x3e9   : > { %v1403_v24 = vpop.eup %1402 }
 0x3ea   : > { %v1023_v26 = vadd.f32 1.0, %v1403_v24 }
 0x3eb   : > { %v1405_v22 = vpop.eup %1404 }
 0x3ec   : > { %v1025_v27 = vmul.f32 %v1023_v26, %v1017_v25  ;;  %v1024_v29 = vadd.f32 1.0, %v1405_v22 }
 0x3ee   : > { %1027 = vst [vmem:[%s1706_s12 + $0x10] sm:$0xff] %v1025_v27  ;;  %v1026_v30 = vmul.f32 %v1024_v29, %v1018_v28 }
 0x3f0   : > { %1028 = vst [vmem:[%s1706_s12 + $0x18] sm:$0xff] %v1026_v30 }
 0x3f1 PF: > { %s17_s24 = sadd.s32 1, %s1412_s24  }
 0x3f2   : > { %p14_p4 = scmp.ge.s32.totalorder %s17_s24, 4  }
 0x3f4   :  { %16 = sbr.rel (!%p14_p4) target bundleno = 1 (0x1), region = 78 }

</bundles_post_ra>
